<compile_context>
chip_gen: v7x
topology: tpu7x:2x2x1
jax: 0.10.0
libtpu: 0.0.40
codegen_flags: <defaults>
</compile_context>

<pallas_src>
import functools

import jax
import jax.numpy as jnp
from jax.experimental import pallas as pl
from jax.experimental.pallas import tpu as pltpu

LANE = 128
_VMEM_LIMIT = 32 * 1024 * 1024          # explicit scoped-VMEM limit (all gens)
_SMALL_W_BYTES = 8 * 1024 * 1024        # weight-resident fast-path threshold
_SMALL_PATH_BUDGET = 24 * 1024 * 1024   # VMEM budget for the fast path


def _round_up(x: int, m: int) -> int:
    return ((x + m - 1) // m) * m


def _sublane(dtype) -> int:
    # Minimum sublane multiple per dtype: f32 -> 8, bf16 -> 16, int8/fp8 -> 32.
    return max(8, 32 // jnp.dtype(dtype).itemsize)


def _pick_tile(dim: int, cap: int, align: int) -> int:
    """Largest multiple of `align` that is <= cap and divides `dim`.

    `dim` is always a multiple of `align` here, so this terminates at `align`.
    """
    t = min(cap, dim)
    t = max(align, (t // align) * align)
    while t > align and dim % t:
        t -= align
    return t


# --------------------------------------------------------------------------
# Kernels
# --------------------------------------------------------------------------
def _mlp_resident_kernel(x_ref, w_ref, b_ref, o_ref):
    # Whole W.T ([D_pad, C_pad]) and bias resident in VMEM; one batch tile
    # per grid step. Single MXU matmul with f32 accumulation.
    acc = jnp.dot(x_ref[...], w_ref[...], preferred_element_type=jnp.float32)
    o_ref[...] = (acc + b_ref[...].astype(jnp.float32)).astype(o_ref.dtype)


def _mlp_tiled_kernel_f32(x_ref, w_ref, b_ref, o_ref):
    # Output is f32: accumulate straight into the k-invariant output tile.
    @pl.when(pl.program_id(2) == 0)
    def _():
        o_ref[...] = jnp.broadcast_to(
            b_ref[...].astype(jnp.float32), o_ref.shape)

    o_ref[...] += jnp.dot(
        x_ref[...], w_ref[...], preferred_element_type=jnp.float32)


def _mlp_tiled_kernel_acc(x_ref, w_ref, b_ref, o_ref, acc_ref):
    # Low-precision output: f32 VMEM accumulator, cast once at the end.
    k = pl.program_id(2)

    @pl.when(k == 0)
    def _():
        acc_ref[...] = jnp.zeros_like(acc_ref)

    acc_ref[...] += jnp.dot(
        x_ref[...], w_ref[...], preferred_element_type=jnp.float32)

    @pl.when(k == pl.num_programs(2) - 1)
    def _():
        o_ref[...] = (
            acc_ref[...] + b_ref[...].astype(jnp.float32)
        ).astype(o_ref.dtype)


# --------------------------------------------------------------------------
# Forward (jitted; weight already transposed + lane-padded)
# --------------------------------------------------------------------------
@functools.partial(jax.jit, static_argnames=("class_size",))
def _mlp_forward_padded(x, wt_p, b_p, *, class_size: int):
    B, D = x.shape
    D_pad, C_pad = wt_p.shape
    dt = x.dtype
    itemsize = jnp.dtype(dt).itemsize
    sub = _sublane(dt)
    B_pad = _round_up(B, sub)

    x_p = x
    if B_pad != B or D_pad != D:
        # Zero-padding on D contributes nothing to the dot product.
        x_p = jnp.pad(x, ((0, B_pad - B), (0, D_pad - D)))

    out_dtype = dt
    w_bytes = D_pad * C_pad * jnp.dtype(wt_p.dtype).itemsize

    if w_bytes <= _SMALL_W_BYTES:
        # ------------------ weight-resident fast path ---------------------
        tm = _pick_tile(B_pad, 512, sub)
        # Expose >= 2 batch blocks when possible (v7x: 2 TensorCores).
        if B_pad // tm < 2 and B_pad >= 2 * sub:
            tm = _pick_tile(B_pad, B_pad // 2, sub)

        def _small_bytes(tm_):
            # Conservative: count everything double-buffered.
            return 2 * itemsize * (
                tm_ * D_pad + D_pad * C_pad + C_pad + tm_ * C_pad)

        while tm > sub and _small_bytes(tm) > _SMALL_PATH_BUDGET:
            tm = _pick_tile(B_pad, tm - sub, sub)

        grid = (B_pad // tm,)
        y_pad = pl.pallas_call(
            _mlp_resident_kernel,
            out_shape=jax.ShapeDtypeStruct((B_pad, C_pad), out_dtype),
            grid_spec=pltpu.PrefetchScalarGridSpec(
                num_scalar_prefetch=0,
                grid=grid,
                in_specs=[
                    pl.BlockSpec((tm, D_pad), lambda i: (i, 0)),      # x tile
                    pl.BlockSpec((D_pad, C_pad), lambda i: (0, 0)),   # W.T (resident)
                    pl.BlockSpec((1, C_pad), lambda i: (0, 0)),       # bias (resident)
                ],
                out_specs=pl.BlockSpec((tm, C_pad), lambda i: (i, 0)),
            ),
            compiler_params=pltpu.CompilerParams(
                dimension_semantics=("parallel",),
                vmem_limit_bytes=_VMEM_LIMIT,
            ),
        )(x_p, wt_p, b_p)
        return y_pad[:B, :class_size]

    # ---------------------- 3-axis tiled path ------------------------------
    tm = _pick_tile(B_pad, 512, sub)
    tn = _pick_tile(C_pad, 512, LANE)
    tk = _pick_tile(D_pad, 1024, LANE)
    # Guarantee >= 2 blocks on at least one parallel axis (v7x megacore).
    if B_pad // tm < 2 and C_pad // tn < 2:
        if C_pad >= 2 * LANE:
            tn = _pick_tile(C_pad, C_pad // 2, LANE)
        elif B_pad >= 2 * sub:
            tm = _pick_tile(B_pad, B_pad // 2, sub)

    grid = (B_pad // tm, C_pad // tn, D_pad // tk)

    if jnp.dtype(out_dtype) == jnp.dtype(jnp.float32):
        kernel = _mlp_tiled_kernel_f32
        scratch = []
    else:
        kernel = _mlp_tiled_kernel_acc
        scratch = [pltpu.VMEM((tm, tn), jnp.float32)]

    y_pad = pl.pallas_call(
        kernel,
        out_shape=jax.ShapeDtypeStruct((B_pad, C_pad), out_dtype),
        grid_spec=pltpu.PrefetchScalarGridSpec(
            num_scalar_prefetch=0,
            grid=grid,
            in_specs=[
                pl.BlockSpec((tm, tk), lambda i, j, k: (i, k)),   # x tile
                pl.BlockSpec((tk, tn), lambda i, j, k: (k, j)),   # W.T tile
                pl.BlockSpec((1, tn), lambda i, j, k: (0, j)),    # bias tile
            ],
            out_specs=pl.BlockSpec((tm, tn), lambda i, j, k: (i, j)),
            scratch_shapes=scratch,
        ),
        compiler_params=pltpu.CompilerParams(
            dimension_semantics=("parallel", "parallel", "arbitrary"),
            vmem_limit_bytes=_VMEM_LIMIT,
        ),
    )(x_p, wt_p, b_p)
    return y_pad[:B, :class_size]


# --------------------------------------------------------------------------
# Module-equivalent wrapper (weight transpose/pad hoisted to init)
# --------------------------------------------------------------------------
class PallasMLP:
    """Pallas-backed equivalent of the PyTorch MLP (dropout -> Linear)."""

    def __init__(self, weight, bias, dropout_ratio: float = 0.0):
        # dropout_ratio == 0 -> dropout is the identity (eval mode / p=0).
        # TODO(synk): implement training-mode dropout if ever needed.
        assert dropout_ratio == 0.0, "only identity dropout implemented"
        C, D = weight.shape
        assert bias.shape == (C,)
        self.class_size = C
        self.input_dim = D
        C_pad = _round_up(C, LANE)
        D_pad = _round_up(D, LANE)
        # One-time layout plumbing: W [C, D] -> W.T [D, C], padded lane-dense.
        wt = jnp.transpose(weight)
        self.wt_p = jnp.pad(wt, ((0, D_pad - D), (0, C_pad - C)))
        self.b_p = jnp.pad(bias, (0, C_pad - C)).reshape(1, C_pad)

    def __call__(self, x):
        assert x.shape[-1] == self.input_dim
        return _mlp_forward_padded(
            x, self.wt_p, self.b_p, class_size=self.class_size)


if __name__ == "__main__":
    # Small shapes consistent with the module: input_dim=32, class_size=10.
    batch = 8
    input_dim = 32
    class_size = 10

    key = jax.random.PRNGKey(0)
    kx, kw, kb = jax.random.split(key, 3)

    x = jax.random.normal(kx, (batch, input_dim), dtype=jnp.float32)
    # Deterministic nn.Linear-style init (uniform in +-1/sqrt(fan_in)).
    bound = 1.0 / (input_dim ** 0.5)
    w = jax.random.uniform(kw, (class_size, input_dim), jnp.float32,
                           minval=-bound, maxval=bound)
    b = jax.random.uniform(kb, (class_size,), jnp.float32,
                           minval=-bound, maxval=bound)

    mlp = PallasMLP(w, b, dropout_ratio=0.0)
    y = mlp(x)
    jax.block_until_ready(y)

    # Reference check against plain JAX (same math as torch nn.Linear).
    y_ref = x @ w.T + b
    assert y.shape == (batch, class_size)
    assert jnp.allclose(y, y_ref, atol=1e-5, rtol=1e-5)

    print("KERNEL_OK")
</pallas_src>

<mosaic_0001>
module attributes {stable_mosaic.version = 11 : i64} {
  func.func @_mlp_resident_kernel(%arg0: i32, %arg1: memref<8x128xf32, #tpu.memory_space<vmem>>, %arg2: memref<128x128xf32, #tpu.memory_space<vmem>>, %arg3: memref<1x128xf32, #tpu.memory_space<vmem>>, %arg4: memref<8x128xf32, #tpu.memory_space<vmem>>) attributes {dimension_semantics = [#tpu.dimension_semantics<parallel>], iteration_bounds = array<i64: 1>, scalar_prefetch = 0 : i64, scratch_operands = 0 : i64, tpu.core_type = #tpu.core_type<tc>, window_params = [{transform_indices = @transform_0, window_bounds = array<i64: 8, 128>}, {pipeline_mode = #tpu.pipeline_mode<synchronous>, transform_indices = @transform_1, window_bounds = array<i64: 128, 128>}, {pipeline_mode = #tpu.pipeline_mode<synchronous>, transform_indices = @transform_2, window_bounds = array<i64: 1, 128>}, {transform_indices = @transform_3, window_bounds = array<i64: 8, 128>}]} {
    %c0 = arith.constant 0 : index
    %c0_0 = arith.constant 0 : index
    %0 = vector.load %arg1[%c0, %c0_0] : memref<8x128xf32, #tpu.memory_space<vmem>>, vector<8x128xf32>
    %c0_1 = arith.constant 0 : index
    %c0_2 = arith.constant 0 : index
    %1 = vector.load %arg2[%c0_1, %c0_2] : memref<128x128xf32, #tpu.memory_space<vmem>>, vector<128x128xf32>
    %cst = arith.constant dense<0.000000e+00> : vector<8x128xf32>
    %2 = tpu.matmul %0, %1, %cst {dimension_numbers = #tpu.dot_dimension_numbers<[1], [0], [0], [1], [0, 0, 1, 1], [], []>} : vector<8x128xf32>, vector<128x128xf32>, vector<8x128xf32> -> vector<8x128xf32>
    %c0_3 = arith.constant 0 : index
    %c0_4 = arith.constant 0 : index
    %3 = vector.load %arg3[%c0_3, %c0_4] : memref<1x128xf32, #tpu.memory_space<vmem>>, vector<1x128xf32>
    %4 = vector.broadcast %3 : vector<1x128xf32> to vector<8x128xf32>
    %5 = arith.addf %2, %4 : vector<8x128xf32>
    %c0_5 = arith.constant 0 : index
    %c0_6 = arith.constant 0 : index
    %6 = vector.load %arg4[%c0_5, %c0_6] : memref<8x128xf32, #tpu.memory_space<vmem>>, vector<8x128xf32>
    tpu.vector_store %arg4[%c0_5, %c0_6], %5 {strides = array<i32>} : memref<8x128xf32, #tpu.memory_space<vmem>>, vector<8x128xf32>,
    return
  }
  func.func @transform_0(%arg0: i32) -> (i32, i32) {
    %c0_i32 = arith.constant 0 : i32
    %c0_i32_0 = arith.constant 0 : i32
    return %arg0, %c0_i32 : i32, i32
  }
  func.func @transform_1(%arg0: i32) -> (i32, i32) {
    %c0_i32 = arith.constant 0 : i32
    %c0_i32_0 = arith.constant 0 : i32
    %c0_i32_1 = arith.constant 0 : i32
    return %c0_i32, %c0_i32_0 : i32, i32
  }
  func.func @transform_2(%arg0: i32) -> (i32, i32) {
    %c0_i32 = arith.constant 0 : i32
    %c0_i32_0 = arith.constant 0 : i32
    %c0_i32_1 = arith.constant 0 : i32
    return %c0_i32, %c0_i32_0 : i32, i32
  }
  func.func @transform_3(%arg0: i32) -> (i32, i32) {
    %c0_i32 = arith.constant 0 : i32
    %c0_i32_0 = arith.constant 0 : i32
    return %arg0, %c0_i32 : i32, i32
  }
}

</mosaic_0001>

<bundles_post_ra>
// kernel: _mlp_forward_padded.1
= control target key start
LH: loop header
LB: loop body
LE: loop exit
PB: predicated region body
PF: predicated region fallthrough
CT: control target
= control target key end

     0   :  { %8 = vsyncpa [#allocation3], 0  ;;  %s328_s0 = inlined_call_operand.vmem [shape: f32[8,128], index: 0, kind: input, shape index: {}]   ;;  %s329_s1 = inlined_call_operand.hbm [shape: f32[128,128], index: 1, kind: input, shape index: {}]   ;;  %s330_s2 = inlined_call_operand.vmem [shape: f32[1,128], index: 2, kind: input, shape index: {}]   ;;  %s331_s3 = inlined_call_operand.hbm [shape: f32[8,128], index: 3, kind: output, shape index: {}]  }
   0x1   :  { %9 = vsyncpa [#allocation4], 0  ;;  %s271_s12 = smov [#allocation2]   ;;  %s223_s16 = scalar_lea.hbm %s329_s1, 2048 }
   0x2   :  { %s17_s13 = sshll.u32 %s271_s12, 4  ;;  %p224_p0 = scmp.ne.s32.totalorder %s329_s1, %s223_s16  ;;  %s18_s13 = int_to_ptr.vmem [resolvable:$true] %s17_s13 }
   0x3   :  { %p227_p1 = scmp.lt.u32.totalorder %s223_s16, %s329_s1 }
   0x5   :  { %p229_p2 = pnand %p227_p1, %p224_p0 }
   0x7   :  { %232 = shalt.err (!%p229_p2)
}
   0x8   :  { %s233_s21 = scalar_lea.vmem %s18_s13, 2048  ;;  %p238_p4 = scmp.lt.s32.totalorder %s18_s13, %s18_s13 }
   0x9   :  { %p234_p3 = scmp.ne.s32.totalorder %s18_s13, %s233_s21  ;;  %p239_p5 = scmp.lt.s32.totalorder %s233_s21, %s233_s21 }
   0xb   :  { %p240_p6 = por %p239_p5, %p238_p4 }
   0xd   :  { %p241_p7 = pnand %p240_p6, %p234_p3 }
   0xf   :  { %244 = shalt.err (!%p241_p7)
}
  0x10   :  { %s272_s22 = smov 128   ;;  %s273_s23 = smov 8  }
  0x11   :  { %23 = dma.hbm_to_vmem [thread:$0]  %s329_s1, 2048, %s18_s13, [#allocation3], %s272_s22, %s272_s22, %s273_s23  }
  0x12   :  { %267 = dma.done.wait [#allocation3], 2048  }
  0x13   :  { %268 = vsyncadd [#allocation3], 4294965248  ;;  %v274_v0 = vmov 0.0|0.0   ;;  %vm275_vm0 = vmmov 0   ;;  %v276_v1 = vmov 0.0   ;;  %v30_v2 = vld [vmem:[#allocation2] sm:$0xff] }
  0x14   :  { %192 = vmatprep.subr.bf16.mxu0 %v274_v0  ;;  %189 = vmatprep.mubr.msk.f32.mxu0 %vm275_vm0, %v276_v1  ;;  %v31_v3 = vld [vmem:[#allocation2 + $0x8] sm:$0xff]  ;;  %v32_v4 = vld [vmem:[#allocation2 + $0x10] sm:$0xff]  ;;  %v33_v6 = vld [vmem:[#allocation2 + $0x18] sm:$0xff]  ;;  %s277_s29 = smov [#allocation5]  }
  0x15   :  { %v193_v5 = vpack.c.bf16 %v31_v3, %v30_v2  ;;  %v196_v7 = vpack.c.bf16 %v33_v6, %v32_v4  ;;  %v34_v8 = vld [vmem:[#allocation2 + $0x20] sm:$0xff]  ;;  %v35_v9 = vld [vmem:[#allocation2 + $0x28] sm:$0xff]  ;;  %v36_v11 = vld [vmem:[#allocation2 + $0x30] sm:$0xff]  ;;  %s130_s30 = sshll.u32 %s277_s29, 4  ;;  %s131_s30 = int_to_ptr.vmem [resolvable:$true] %s130_s30 }
  0x16   :  { %v199_v10 = vpack.c.bf16 %v35_v9, %v34_v8  ;;  %v37_v12 = vld [vmem:[#allocation2 + $0x38] sm:$0xff]  ;;  %v38_v14 = vld [vmem:[#allocation2 + $0x40] sm:$0xff]  ;;  %v39_v15 = vld [vmem:[#allocation2 + $0x48] sm:$0xff]  ;;  %s245_s4 = scalar_lea.vmem %s131_s30, 128  ;;  %p250_p9 = scmp.lt.s32.totalorder %s131_s30, %s131_s30 }
  0x17   :  { %194 = vmatpush3.bf16.msra.mxu0 %v193_v5  ;;  %v202_v13 = vpack.c.bf16 %v37_v12, %v36_v11  ;;  %v205_v16 = vpack.c.bf16 %v39_v15, %v38_v14  ;;  %v40_v17 = vld [vmem:[#allocation2 + $0x50] sm:$0xff]  ;;  %v41_v18 = vld [vmem:[#allocation2 + $0x58] sm:$0xff]  ;;  %v42_v20 = vld [vmem:[#allocation2 + $0x60] sm:$0xff]  ;;  %p246_p8 = scmp.ne.s32.totalorder %s131_s30, %s245_s4  ;;  %p251_p10 = scmp.lt.s32.totalorder %s245_s4, %s245_s4 }
  0x18   :  { %195 = vmatprep.subr.bf16.mxu0 %v274_v0  ;;  %v208_v19 = vpack.c.bf16 %v41_v18, %v40_v17  ;;  %v43_v21 = vld [vmem:[#allocation2 + $0x68] sm:$0xff]  ;;  %v44_v23 = vld [vmem:[#allocation2 + $0x70] sm:$0xff]  ;;  %v45_v24 = vld [vmem:[#allocation2 + $0x78] sm:$0xff] }
  0x19   :  { %v211_v22 = vpack.c.bf16 %v43_v21, %v42_v20  ;;  %v214_v25 = vpack.c.bf16 %v45_v24, %v44_v23  ;;  %v29_v26 = vld [vmem:[%s328_s0] sm:$0xff]  ;;  %p252_p11 = por %p251_p10, %p250_p9 }
  0x1a   :  { %v139_v27 = vld [vmem:[%s330_s2] ss:$0 sm:$0xff] }
  0x1b   :  { %197 = vmatpush3.bf16.msra.mxu0 %v196_v7  ;;  %p253_p12 = pnand %p252_p11, %p246_p8 }
  0x1c   :  { %198 = vmatprep.subr.bf16.mxu0 %v274_v0 }
  0x1f   :  { %200 = vmatpush3.bf16.msra.mxu0 %v199_v10 }
  0x20   :  { %201 = vmatprep.subr.bf16.mxu0 %v274_v0 }
  0x23   :  { %203 = vmatpush3.bf16.msra.mxu0 %v202_v13 }
  0x24   :  { %204 = vmatprep.subr.bf16.mxu0 %v274_v0 }
  0x27   :  { %206 = vmatpush3.bf16.msra.mxu0 %v205_v16 }
  0x28   :  { %207 = vmatprep.subr.bf16.mxu0 %v274_v0 }
  0x2b   :  { %209 = vmatpush3.bf16.msra.mxu0 %v208_v19 }
  0x2c   :  { %210 = vmatprep.subr.bf16.mxu0 %v274_v0 }
  0x2f   :  { %212 = vmatpush3.bf16.msra.mxu0 %v211_v22 }
  0x30   :  { %213 = vmatprep.subr.bf16.mxu0 %v274_v0 }
  0x33   :  { %215 = vmatpush3.bf16.msra.mxu0 %v214_v25 }
  0x36   :  { %190 = vmatmul.mubr.f32.vlgmr.msra.gmra.mrb[0].mxu0 %v29_v26 }
 0x109   :  { %v119_v28 = vpop.f32.mrb[0].mxu0 }
 0x10a   :  { %v120_v29 = vadd.f32 %v139_v27, %v119_v28  ;;  %v191_v30 = vpop.f32.mrb[1].mxu0 }
 0x10c   :  { %123 = vst [vmem:[#allocation5] sm:$0xff] %v120_v29 }
 0x10d   :  { %256 = shalt.err (!%p253_p12)
}
 0x10e   :  { %s257_s6 = scalar_lea.hbm %s331_s3, 128 }
 0x10f   :  { %p258_p13 = scmp.ne.s32.totalorder %s331_s3, %s257_s6  ;;  %p261_p0 = scmp.lt.u32.totalorder %s257_s6, %s331_s3 }
 0x111   :  { %p263_p1 = pnand %p261_p0, %p258_p13 }
 0x113   :  { %266 = shalt.err (!%p263_p1)
}
 0x114   :  { %133 = dma.vmem_to_hbm [thread:$0]  %s131_s30, 128, %s331_s3, [#allocation4]  }
 0x115   :  { %269 = dma.done.wait [#allocation4], 128  }
 0x116   :  { %270 = vsyncadd [#allocation4], 4294967168 }
 0x117   :  { %137 = vsyncpa [#allocation3], 1 }
 0x118   :  { %138 = vsyncpa [#allocation4], 1 }

</bundles_post_ra>
